<compile_context>
chip_gen: v5e
topology: v5e:2x2
jax: 0.10.0
libtpu: 0.0.40
codegen_flags: <defaults>
</compile_context>

<pallas_src>
import functools

import jax
import jax.numpy as jnp
from jax.experimental import pallas as pl
from jax.experimental.pallas import tpu as pltpu

LANE = 128


def _round_up(n, m):
    return ((n + m - 1) // m) * m


# ---------------------------------------------------------------------------
# Pallas kernel: the whole 3-layer MLP (matmul + bias + sigmoid) fused, tiled
# over the batch dimension.  All (padded) parameters are grid-invariant VMEM
# residents; each grid step processes one batch tile against the full set.
# ---------------------------------------------------------------------------
def hsicnet_mlp_kernel(x_ref, w0_ref, b0_ref, w1_ref, b1_ref, w2_ref, b2_ref,
                       o_ref):
    def sigmoid(v):  # exact, exp on the EUP slot
        return 1.0 / (1.0 + jnp.exp(-v))

    # layer 0: Linear + Sigmoid (MXU matmul, f32 accumulation)
    h = jnp.dot(x_ref[...], w0_ref[...],
                preferred_element_type=jnp.float32) + b0_ref[...]
    h = sigmoid(h)

    # layer 1: Linear + Sigmoid
    w1 = w1_ref[...]
    h = jnp.dot(h.astype(w1.dtype), w1,
                preferred_element_type=jnp.float32) + b1_ref[...]
    h = sigmoid(h)

    # layer 2 (final): Linear only; (tile, out_dim) store (out_dim == extent)
    w2 = w2_ref[...]
    o_ref[...] = (jnp.dot(h.astype(w2.dtype), w2,
                          preferred_element_type=jnp.float32)
                  + b2_ref[...]).astype(o_ref.dtype)


# ---------------------------------------------------------------------------
# One-time parameter preparation: pad hidden dims to 128 lanes, cast the MXU
# operands.  Done ONCE; the jitted forward re-uses the prepared arrays.
# ---------------------------------------------------------------------------
def prepare_params(params, matmul_dtype=jnp.float32):
    (w0, b0), (w1, b1), (w2, b2) = params["l0"], params["l1"], params["l2"]
    md = jnp.dtype(matmul_dtype)
    in_dim, h0 = w0.shape
    h1, out_dim = w1.shape[1], w2.shape[1]
    h0_p, h1_p = _round_up(h0, LANE), _round_up(h1, LANE)

    def pad2(a, rows, cols):
        return jnp.pad(a, ((0, rows - a.shape[0]), (0, cols - a.shape[1])))

    return {
        "w0": pad2(w0, in_dim, h0_p).astype(md),     # (in_dim, h0_p)
        "b0": pad2(b0, 1, h0_p).astype(jnp.float32),
        "w1": pad2(w1, h0_p, h1_p).astype(md),       # (h0_p, h1_p)
        "b1": pad2(b1, 1, h1_p).astype(jnp.float32),
        "w2": pad2(w2, h1_p, out_dim).astype(md),    # (h1_p, out_dim) - lanes unpadded
        "b2": b2.astype(jnp.float32),                # (1, out_dim)
    }


def _choose_tile(batch, max_tile, min_tile):
    # >=4 grid steps when the batch allows it (>=2 pipelined steps per v7x
    # TensorCore), tiles of >=128 rows (amortizes ~0.35us/step overhead),
    # capped at max_tile (v6e sweet spot 512-1024, VMEM-safe on v7x).
    batch_r = _round_up(batch, min_tile)
    tile = min(max_tile, _round_up(pl.cdiv(batch_r, 4), min_tile), batch_r)
    tile = max(tile, min(128, batch_r), min_tile)
    return _round_up(min(tile, batch_r), min_tile)


@functools.partial(jax.jit, static_argnames=("batch_tile",))
def hsicnet_forward(x, prepared, batch_tile=512):
    """x: (batch, input_dim) f32.  prepared: output of prepare_params().

    Matmul operands use prepared['w0'].dtype (f32 for exact module semantics,
    bf16 recommended on v5e/v6e/v7x -- MXU is bf16-native on all of them).
    Accumulation, biases, sigmoid and the stored output are always f32.
    """
    w0, b0 = prepared["w0"], prepared["b0"]
    w1, b1 = prepared["w1"], prepared["b1"]
    w2, b2 = prepared["w2"], prepared["b2"]

    batch, input_dim = x.shape
    assert input_dim == w0.shape[0]
    h0_p, h1_p, out_dim = w0.shape[1], w1.shape[1], w2.shape[1]
    md = w0.dtype

    # Min second-to-last tile dim: 8 for f32, 16 for bf16 (review correctness
    # note: bf16 blocks need a (16,128) min tile).
    min_tile = 16 if jnp.dtype(md).itemsize < 4 else 8
    tile = _choose_tile(batch, batch_tile, min_tile)
    batch_p = _round_up(batch, tile)

    xp = x.astype(md)
    if batch_p != batch:
        xp = jnp.pad(xp, ((0, batch_p - batch), (0, 0)))

    grid = (batch_p // tile,)

    def invariant(shape):
        n = len(shape)
        return pl.BlockSpec(shape, lambda i: (0,) * n)

    itemsize = jnp.dtype(md).itemsize
    cost = pl.CostEstimate(
        flops=int(2 * batch_p * (input_dim * h0_p + h0_p * h1_p
                                 + h1_p * out_dim)),
        transcendentals=int(batch_p * (h0_p + h1_p)),
        bytes_accessed=int(batch_p * input_dim * itemsize
                           + (w0.size + w1.size + w2.size) * itemsize
                           + (b0.size + b1.size + b2.size) * 4
                           + batch_p * out_dim * 4),
    )

    out = pl.pallas_call(
        hsicnet_mlp_kernel,
        out_shape=jax.ShapeDtypeStruct((batch_p, out_dim), jnp.float32),
        grid_spec=pltpu.PrefetchScalarGridSpec(
            num_scalar_prefetch=0,
            grid=grid,
            in_specs=[
                pl.BlockSpec((tile, input_dim), lambda i: (i, 0)),
                invariant(w0.shape), invariant(b0.shape),
                invariant(w1.shape), invariant(b1.shape),
                invariant(w2.shape), invariant(b2.shape),
            ],
            out_specs=pl.BlockSpec((tile, out_dim), lambda i: (i, 0)),
        ),
        compiler_params=pltpu.CompilerParams(
            dimension_semantics=("parallel",)),
        cost_estimate=cost,
    )(xp, w0, b0, w1, b1, w2, b2)

    if batch_p != batch:
        out = out[:batch]
    return out


# ---------------------------------------------------------------------------
# Deterministic parameter construction (PyTorch nn.Linear-style init).
# PyTorch stores W as (out, in); we pre-transpose to (in, out) for the kernel.
# ---------------------------------------------------------------------------
def make_params(key, input_dim, layers):
    dims = [input_dim] + list(layers) + [input_dim]
    params = {}
    for li in range(len(dims) - 1):
        fan_in, fan_out = dims[li], dims[li + 1]
        key, kw, kb = jax.random.split(key, 3)
        bound = fan_in ** -0.5
        w_t = jax.random.uniform(kw, (fan_in, fan_out), jnp.float32,
                                 -bound, bound)          # already (in, out)
        b = jax.random.uniform(kb, (1, fan_out), jnp.float32, -bound, bound)
        params[f"l{li}"] = (w_t, b)
    return params


def reference_forward(x, params):
    (w0, b0), (w1, b1), (w2, b2) = params["l0"], params["l1"], params["l2"]
    hp = jax.lax.Precision.HIGHEST

    def sigmoid(v):
        return 1.0 / (1.0 + jnp.exp(-v))

    h = sigmoid(jnp.dot(x, w0, precision=hp) + b0)
    h = sigmoid(jnp.dot(h, w1, precision=hp) + b1)
    return jnp.dot(h, w2, precision=hp) + b2


if __name__ == "__main__":
    key = jax.random.PRNGKey(0)
    batch, input_dim = 512, 16        # -> tile=128, 4 grid steps
    layers = [32, 32]

    key, kx = jax.random.split(key)
    x = jax.random.normal(kx, (batch, input_dim), jnp.float32)
    params = make_params(key, input_dim, layers)
    ref = reference_forward(x, params)

    # f32 operand path (module semantics).  Tolerance covers the fact that
    # XLA's and Mosaic's f32 MXU algorithms (multi-pass bf16) may differ.
    prepared_f32 = prepare_params(params, jnp.float32)
    out = jax.block_until_ready(hsicnet_forward(x, prepared_f32))
    assert out.shape == (batch, input_dim)
    assert jnp.allclose(out, ref, atol=2e-2, rtol=2e-2)

    # bf16 MXU-operand path (recommended on v5e/v6e/v7x); f32 accumulation,
    # f32 bias/sigmoid/output.  Looser tolerance: x/activations are also bf16.
    prepared_bf16 = prepare_params(params, jnp.bfloat16)
    out_bf16 = jax.block_until_ready(hsicnet_forward(x, prepared_bf16))
    assert out_bf16.shape == (batch, input_dim)
    assert jnp.allclose(out_bf16, ref, atol=1e-1, rtol=1e-1)

    # Non-divisible batch exercises the row-padding + row-slice path.
    out_odd = jax.block_until_ready(hsicnet_forward(x[:300], prepared_f32))
    assert out_odd.shape == (300, input_dim)
    assert jnp.allclose(out_odd, ref[:300], atol=2e-2, rtol=2e-2)

    print("KERNEL_OK")
</pallas_src>

<mosaic_0001>
module attributes {stable_mosaic.version = 11 : i64} {
  func.func @hsicnet_mlp_kernel(%arg0: i32, %arg1: memref<128x16xf32, #tpu.memory_space<vmem>>, %arg2: memref<16x128xf32, #tpu.memory_space<vmem>>, %arg3: memref<1x128xf32, #tpu.memory_space<vmem>>, %arg4: memref<128x128xf32, #tpu.memory_space<vmem>>, %arg5: memref<1x128xf32, #tpu.memory_space<vmem>>, %arg6: memref<128x16xf32, #tpu.memory_space<vmem>>, %arg7: memref<1x16xf32, #tpu.memory_space<vmem>>, %arg8: memref<128x16xf32, #tpu.memory_space<vmem>>) attributes {dimension_semantics = [#tpu.dimension_semantics<parallel>], iteration_bounds = array<i64: 4>, scalar_prefetch = 0 : i64, scratch_operands = 0 : i64, tpu.core_type = #tpu.core_type<tc>, window_params = [{transform_indices = @transform_0, window_bounds = array<i64: 128, 16>}, {pipeline_mode = #tpu.pipeline_mode<synchronous>, transform_indices = @transform_1, window_bounds = array<i64: 16, 128>}, {pipeline_mode = #tpu.pipeline_mode<synchronous>, transform_indices = @transform_2, window_bounds = array<i64: 1, 128>}, {pipeline_mode = #tpu.pipeline_mode<synchronous>, transform_indices = @transform_3, window_bounds = array<i64: 128, 128>}, {pipeline_mode = #tpu.pipeline_mode<synchronous>, transform_indices = @transform_4, window_bounds = array<i64: 1, 128>}, {pipeline_mode = #tpu.pipeline_mode<synchronous>, transform_indices = @transform_5, window_bounds = array<i64: 128, 16>}, {pipeline_mode = #tpu.pipeline_mode<synchronous>, transform_indices = @transform_6, window_bounds = array<i64: 1, 16>}, {transform_indices = @transform_7, window_bounds = array<i64: 128, 16>}]} {
    %c0 = arith.constant 0 : index
    %c0_0 = arith.constant 0 : index
    %0 = vector.load %arg1[%c0, %c0_0] : memref<128x16xf32, #tpu.memory_space<vmem>>, vector<128x16xf32>
    %c0_1 = arith.constant 0 : index
    %c0_2 = arith.constant 0 : index
    %1 = vector.load %arg2[%c0_1, %c0_2] : memref<16x128xf32, #tpu.memory_space<vmem>>, vector<16x128xf32>
    %cst = arith.constant dense<0.000000e+00> : vector<128x128xf32>
    %2 = tpu.matmul %0, %1, %cst {dimension_numbers = #tpu.dot_dimension_numbers<[1], [0], [0], [1], [0, 0, 1, 1], [], []>} : vector<128x16xf32>, vector<16x128xf32>, vector<128x128xf32> -> vector<128x128xf32>
    %c0_3 = arith.constant 0 : index
    %c0_4 = arith.constant 0 : index
    %3 = vector.load %arg3[%c0_3, %c0_4] : memref<1x128xf32, #tpu.memory_space<vmem>>, vector<1x128xf32>
    %4 = vector.broadcast %3 : vector<1x128xf32> to vector<128x128xf32>
    %5 = arith.addf %2, %4 : vector<128x128xf32>
    %cst_5 = arith.constant 0.000000e+00 : f32
    %6 = vector.broadcast %cst_5 : f32 to vector<128x128xf32>
    %7 = arith.subf %6, %5 : vector<128x128xf32>
    %8 = math.exp %7 : vector<128x128xf32>
    %cst_6 = arith.constant 1.000000e+00 : f32
    %9 = vector.broadcast %cst_6 : f32 to vector<128x128xf32>
    %10 = arith.addf %9, %8 : vector<128x128xf32>
    %cst_7 = arith.constant 1.000000e+00 : f32
    %11 = vector.broadcast %cst_7 : f32 to vector<128x128xf32>
    %12 = arith.divf %11, %10 : vector<128x128xf32>
    %c0_8 = arith.constant 0 : index
    %c0_9 = arith.constant 0 : index
    %13 = vector.load %arg4[%c0_8, %c0_9] : memref<128x128xf32, #tpu.memory_space<vmem>>, vector<128x128xf32>
    %cst_10 = arith.constant dense<0.000000e+00> : vector<128x128xf32>
    %14 = tpu.matmul %12, %13, %cst_10 {dimension_numbers = #tpu.dot_dimension_numbers<[1], [0], [0], [1], [0, 0, 1, 1], [], []>} : vector<128x128xf32>, vector<128x128xf32>, vector<128x128xf32> -> vector<128x128xf32>
    %c0_11 = arith.constant 0 : index
    %c0_12 = arith.constant 0 : index
    %15 = vector.load %arg5[%c0_11, %c0_12] : memref<1x128xf32, #tpu.memory_space<vmem>>, vector<1x128xf32>
    %16 = vector.broadcast %15 : vector<1x128xf32> to vector<128x128xf32>
    %17 = arith.addf %14, %16 : vector<128x128xf32>
    %cst_13 = arith.constant 0.000000e+00 : f32
    %18 = vector.broadcast %cst_13 : f32 to vector<128x128xf32>
    %19 = arith.subf %18, %17 : vector<128x128xf32>
    %20 = math.exp %19 : vector<128x128xf32>
    %cst_14 = arith.constant 1.000000e+00 : f32
    %21 = vector.broadcast %cst_14 : f32 to vector<128x128xf32>
    %22 = arith.addf %21, %20 : vector<128x128xf32>
    %cst_15 = arith.constant 1.000000e+00 : f32
    %23 = vector.broadcast %cst_15 : f32 to vector<128x128xf32>
    %24 = arith.divf %23, %22 : vector<128x128xf32>
    %c0_16 = arith.constant 0 : index
    %c0_17 = arith.constant 0 : index
    %25 = vector.load %arg6[%c0_16, %c0_17] : memref<128x16xf32, #tpu.memory_space<vmem>>, vector<128x16xf32>
    %cst_18 = arith.constant dense<0.000000e+00> : vector<128x16xf32>
    %26 = tpu.matmul %24, %25, %cst_18 {dimension_numbers = #tpu.dot_dimension_numbers<[1], [0], [0], [1], [0, 0, 1, 1], [], []>} : vector<128x128xf32>, vector<128x16xf32>, vector<128x16xf32> -> vector<128x16xf32>
    %c0_19 = arith.constant 0 : index
    %c0_20 = arith.constant 0 : index
    %27 = vector.load %arg7[%c0_19, %c0_20] : memref<1x16xf32, #tpu.memory_space<vmem>>, vector<1x16xf32>
    %28 = vector.broadcast %27 : vector<1x16xf32> to vector<128x16xf32>
    %29 = arith.addf %26, %28 : vector<128x16xf32>
    %c0_21 = arith.constant 0 : index
    %c0_22 = arith.constant 0 : index
    %30 = vector.load %arg8[%c0_21, %c0_22] : memref<128x16xf32, #tpu.memory_space<vmem>>, vector<128x16xf32>
    tpu.vector_store %arg8[%c0_21, %c0_22], %29 {strides = array<i32>} : memref<128x16xf32, #tpu.memory_space<vmem>>, vector<128x16xf32>,
    return
  }
  func.func @transform_0(%arg0: i32) -> (i32, i32) {
    %c0_i32 = arith.constant 0 : i32
    %c0_i32_0 = arith.constant 0 : i32
    return %arg0, %c0_i32 : i32, i32
  }
  func.func @transform_1(%arg0: i32) -> (i32, i32) {
    %c0_i32 = arith.constant 0 : i32
    %c0_i32_0 = arith.constant 0 : i32
    %c0_i32_1 = arith.constant 0 : i32
    return %c0_i32, %c0_i32_0 : i32, i32
  }
  func.func @transform_2(%arg0: i32) -> (i32, i32) {
    %c0_i32 = arith.constant 0 : i32
    %c0_i32_0 = arith.constant 0 : i32
    %c0_i32_1 = arith.constant 0 : i32
    return %c0_i32, %c0_i32_0 : i32, i32
  }
  func.func @transform_3(%arg0: i32) -> (i32, i32) {
    %c0_i32 = arith.constant 0 : i32
    %c0_i32_0 = arith.constant 0 : i32
    %c0_i32_1 = arith.constant 0 : i32
    return %c0_i32, %c0_i32_0 : i32, i32
  }
  func.func @transform_4(%arg0: i32) -> (i32, i32) {
    %c0_i32 = arith.constant 0 : i32
    %c0_i32_0 = arith.constant 0 : i32
    %c0_i32_1 = arith.constant 0 : i32
    return %c0_i32, %c0_i32_0 : i32, i32
  }
  func.func @transform_5(%arg0: i32) -> (i32, i32) {
    %c0_i32 = arith.constant 0 : i32
    %c0_i32_0 = arith.constant 0 : i32
    %c0_i32_1 = arith.constant 0 : i32
    return %c0_i32, %c0_i32_0 : i32, i32
  }
  func.func @transform_6(%arg0: i32) -> (i32, i32) {
    %c0_i32 = arith.constant 0 : i32
    %c0_i32_0 = arith.constant 0 : i32
    %c0_i32_1 = arith.constant 0 : i32
    return %c0_i32, %c0_i32_0 : i32, i32
  }
  func.func @transform_7(%arg0: i32) -> (i32, i32) {
    %c0_i32 = arith.constant 0 : i32
    %c0_i32_0 = arith.constant 0 : i32
    return %arg0, %c0_i32 : i32, i32
  }
}

</mosaic_0001>

<bundles_post_ra>
// kernel: hsicnet_forward.1
= control target key start
LH: loop header
LB: loop body
LE: loop exit
PB: predicated region body
PF: predicated region fallthrough
CT: control target
= control target key end

     0   :  { %s1514_s24 = smov 0   ;;  %s1753_s0 = inlined_call_operand.vmem [shape: f32[512,16], index: 0, kind: input, shape index: {}]   ;;  %s1754_s1 = inlined_call_operand.vmem [shape: f32[16,128], index: 1, kind: input, shape index: {}]   ;;  %s1755_s2 = inlined_call_operand.vmem [shape: f32[1,128], index: 2, kind: input, shape index: {}]   ;;  %s1756_s3 = inlined_call_operand.vmem [shape: f32[128,128], index: 3, kind: input, shape index: {}]   ;;  %s1757_s4 = inlined_call_operand.vmem [shape: f32[1,128], index: 4, kind: input, shape index: {}]   ;;  %s1758_s5 = inlined_call_operand.vmem [shape: f32[128,16], index: 5, kind: input, shape index: {}]   ;;  %s1759_s6 = inlined_call_operand.vmem [shape: f32[1,16], index: 6, kind: input, shape index: {}]   ;;  %s1760_s7 = inlined_call_operand.vmem [shape: f32[512,16], index: 7, kind: output, shape index: {}]  }
   0x1 LB: > { %s1268_s25 = sadd.s32 4294967295, %s1472_s24   ;;  %p1272_p0 = scmp.ge.s32.totalorder %s1472_s24, 1  ;;  %s1472_s24 = sphi %s1514_s24, %s17_s24  }
   0x2   : > { %p238_p1 = scmp.lt.s32.totalorder %s1472_s24, 5 }
   0x4   : > { %p239_p2 = pnand %p1272_p0, %p238_p1 }
   0x5   : > { %s1273_s30 = sshll.u32 (!%p239_p2), %s1268_s25, 4 }
   0x6   : > { %242 = sbr.rel (%p239_p2) target bundleno = 592 (0x250), region = 48  ;;  %p271_p3 = scmp.lt.s32.totalorder (!%p239_p2), %s1273_s30, 63 }
   0xb   : > { %v299_v0 = vld [vmem:[%s1754_s1 + $0x8] sm:$0xff]  ;;  %v298_v1 = vld [vmem:[%s1754_s1] sm:$0xff]  ;;  %s1762_s30 = smov (!%p271_p3, %s1273_s30), 63  ;;  %vm304_vm0 = vcmask 130048   ;;  %v737_v15 = vld [vmem:[%s1756_s3 + $0x78] sm:$0xff] }
   0xc   : > { %367 = vmatpush.msra.mxu0 %v299_v0  ;;  %s1274_s8 = sshll.u32 %s1762_s30, 3  ;;  %742 = vmatpush.msra.mxu1 %v737_v15  ;;  %v736_v16 = vld [vmem:[%s1756_s3 + $0x70] sm:$0xff]  ;;  %v735_v17 = vld [vmem:[%s1756_s3 + $0x68] sm:$0xff]  ;;  %v734_v18 = vld [vmem:[%s1756_s3 + $0x60] sm:$0xff] }
   0xd   : > { %s1536_s11 = scalar_lea.vmem %s1753_s0, %s1274_s8  ;;  %1295 = vmatpush.msra.mxu3 %v737_v15  ;;  %v733_v20 = vld [vmem:[%s1756_s3 + $0x58] sm:$0xff]  ;;  %v732_v21 = vld [vmem:[%s1756_s3 + $0x50] sm:$0xff]  ;;  %v731_v22 = vld [vmem:[%s1756_s3 + $0x48] sm:$0xff]  ;;  %s1716_s25 = scalar_lea.vmem %s1760_s7, %s1274_s8 }
   0xe   : > { %368 = vmatpush.msra.mxu0 %v298_v1  ;;  %v282_v2 = vld [vmem:[%s1536_s11] sm:$0xff]  ;;  %v283_v3 = vld [vmem:[%s1536_s11 + $0x8] sm:$0xff]  ;;  %v284_v4 = vld [vmem:[%s1536_s11 + $0x10] sm:$0xff]  ;;  %743 = vmatpush.msra.mxu1 %v736_v16 }
   0xf   : > { %1277 = vmatmul.msk.f32.vlgmr.msra.gmra.mxu0 %vm304_vm0, %v282_v2  ;;  %v285_v5 = vld [vmem:[%s1536_s11 + $0x18] sm:$0xff]  ;;  %v286_v6 = vld [vmem:[%s1536_s11 + $0x20] sm:$0xff]  ;;  %v287_v7 = vld [vmem:[%s1536_s11 + $0x28] sm:$0xff]  ;;  %1296 = vmatpush.msra.mxu3 %v736_v16 }
  0x10   : > { %v288_v8 = vld [vmem:[%s1536_s11 + $0x30] sm:$0xff]  ;;  %v289_v9 = vld [vmem:[%s1536_s11 + $0x38] sm:$0xff]  ;;  %v290_v10 = vld [vmem:[%s1536_s11 + $0x40] sm:$0xff]  ;;  %744 = vmatpush.msra.mxu1 %v735_v17 }
  0x11   : > { %v291_v11 = vld [vmem:[%s1536_s11 + $0x48] sm:$0xff]  ;;  %v292_v12 = vld [vmem:[%s1536_s11 + $0x50] sm:$0xff]  ;;  %v293_v13 = vld [vmem:[%s1536_s11 + $0x58] sm:$0xff]  ;;  %1297 = vmatpush.msra.mxu3 %v735_v17 }
  0x12   : > { %v294_v14 = vld [vmem:[%s1536_s11 + $0x60] sm:$0xff]  ;;  %v295_v19 = vld [vmem:[%s1536_s11 + $0x68] sm:$0xff]  ;;  %745 = vmatpush.msra.mxu1 %v734_v18  ;;  %v296_v24 = vld [vmem:[%s1536_s11 + $0x70] sm:$0xff] }
  0x13   : > { %1298 = vmatpush.msra.mxu3 %v734_v18  ;;  %v730_v23 = vld [vmem:[%s1756_s3 + $0x40] sm:$0xff]  ;;  %v729_v25 = vld [vmem:[%s1756_s3 + $0x38] sm:$0xff]  ;;  %v728_v26 = vld [vmem:[%s1756_s3 + $0x30] sm:$0xff] }
  0x14   : > { %746 = vmatpush.msra.mxu1 %v733_v20  ;;  %v727_v27 = vld [vmem:[%s1756_s3 + $0x28] sm:$0xff]  ;;  %v726_v28 = vld [vmem:[%s1756_s3 + $0x20] sm:$0xff]  ;;  %v297_v29 = vld [vmem:[%s1536_s11 + $0x78] sm:$0xff] }
  0x15   : > { %1299 = vmatpush.msra.mxu3 %v733_v20  ;;  %v725_v30 = vld [vmem:[%s1756_s3 + $0x18] sm:$0xff]  ;;  %v724_v31 = vld [vmem:[%s1756_s3 + $0x10] sm:$0xff]  ;;  %v1615_v32 = vld [vmem:[%s1755_s2] ss:$0 sm:$0xff] }
  0x16   : > { %747 = vmatpush.msra.mxu1 %v732_v21  ;;  %v723_v33 = vld [vmem:[%s1756_s3 + $0x8] sm:$0xff]  ;;  %v722_v34 = vld [vmem:[%s1756_s3] sm:$0xff] }
  0x17   : > { %1278 = vmatmul.msk.f32.gmra.mxu0 %vm304_vm0, %v283_v3  ;;  %1300 = vmatpush.msra.mxu3 %v732_v21 }
  0x18   : > { %748 = vmatpush.msra.mxu1 %v731_v22 }
  0x19   : > { %1301 = vmatpush.msra.mxu3 %v731_v22 }
  0x1a   : > { %749 = vmatpush.msra.mxu1 %v730_v23 }
  0x1b   : > { %1302 = vmatpush.msra.mxu3 %v730_v23 }
  0x1c   : > { %750 = vmatpush.msra.mxu1 %v729_v25 }
  0x1d   : > { %1303 = vmatpush.msra.mxu3 %v729_v25 }
  0x1e   : > { %751 = vmatpush.msra.mxu1 %v728_v26 }
  0x1f   : > { %1279 = vmatmul.msk.f32.gmra.mxu0 %vm304_vm0, %v284_v4  ;;  %1304 = vmatpush.msra.mxu3 %v728_v26 }
  0x20   : > { %752 = vmatpush.msra.mxu1 %v727_v27 }
  0x21   : > { %1305 = vmatpush.msra.mxu3 %v727_v27 }
  0x22   : > { %753 = vmatpush.msra.mxu1 %v726_v28 }
  0x23   : > { %1306 = vmatpush.msra.mxu3 %v726_v28 }
  0x24   : > { %754 = vmatpush.msra.mxu1 %v725_v30 }
  0x25   : > { %1307 = vmatpush.msra.mxu3 %v725_v30 }
  0x26   : > { %755 = vmatpush.msra.mxu1 %v724_v31 }
  0x27   : > { %1280 = vmatmul.msk.f32.gmra.mxu0 %vm304_vm0, %v285_v5  ;;  %1308 = vmatpush.msra.mxu3 %v724_v31 }
  0x28   : > { %756 = vmatpush.msra.mxu1 %v723_v33 }
  0x29   : > { %1309 = vmatpush.msra.mxu3 %v723_v33 }
  0x2a   : > { %757 = vmatpush.msra.mxu1 %v722_v34 }
  0x2b   : > { %1310 = vmatpush.msra.mxu3 %v722_v34 }
  0x2f   : > { %1281 = vmatmul.msk.f32.gmra.mxu0 %vm304_vm0, %v286_v6 }
  0x37   : > { %1282 = vmatmul.msk.f32.gmra.mxu0 %vm304_vm0, %v287_v7 }
  0x3f   : > { %1283 = vmatmul.msk.f32.gmra.mxu0 %vm304_vm0, %v288_v8 }
  0x47   : > { %1284 = vmatmul.msk.f32.gmra.mxu0 %vm304_vm0, %v289_v9 }
  0x4f   : > { %1285 = vmatmul.msk.f32.gmra.mxu0 %vm304_vm0, %v290_v10 }
  0x57   : > { %1286 = vmatmul.msk.f32.gmra.mxu0 %vm304_vm0, %v291_v11 }
  0x5f   : > { %1287 = vmatmul.msk.f32.gmra.mxu0 %vm304_vm0, %v292_v12 }
  0x67   : > { %1288 = vmatmul.msk.f32.gmra.mxu0 %vm304_vm0, %v293_v13 }
  0x6f   : > { %1289 = vmatmul.msk.f32.gmra.mxu0 %vm304_vm0, %v294_v14 }
  0x77   : > { %1290 = vmatmul.msk.f32.gmra.mxu0 %vm304_vm0, %v295_v19 }
  0x7f   : > { %1291 = vmatmul.msk.f32.gmra.mxu0 %vm304_vm0, %v296_v24 }
  0x87   : > { %1292 = vmatmul.msk.f32.gmra.mxu0 %vm304_vm0, %v297_v29 }
  0x8c   : > { %v370_v35 = vpop.f32.mrf.mxu0 }
  0x8d   : > { %v371_v36 = vadd.f32 %v1615_v32, %v370_v35 }
  0x8f   : > { %v418_v37 = vsub.f32 0.0, %v371_v36 }
  0x91   : > { %v434_v38 = vmul.f32 1.442695, %v418_v37 }
  0x93   : > { %1338 = vpow2.f32 %v434_v38 }
  0x94   : > { %v373_v39 = vpop.f32.mrf.mxu0 }
  0x95   : > { %v374_v40 = vadd.f32 %v1615_v32, %v373_v39 }
  0x97   : > { %v419_v41 = vsub.f32 0.0, %v374_v40 }
  0x99   : > { %v1339_v42 = vpop.eup %1338  ;;  %v436_v43 = vmul.f32 1.442695, %v419_v41 }
  0x9a   : > { %v466_v44 = vadd.f32 1.0, %v1339_v42 }
  0x9b   : > { %1340 = vpow2.f32 %v436_v43 }
  0x9c   : > { %1342 = vrcp.f32 %v466_v44  ;;  %v376_v45 = vpop.f32.mrf.mxu0  ;;  %v493_v56 = vand.u32 2147483648, %v466_v44  ;;  %v491_v59 = vand.u32 2147483647, %v466_v44  ;;  %vm487_vm2 = vweird.f32 %v466_v44 }
  0x9d   : > { %v377_v46 = vadd.f32 %v1615_v32, %v376_v45 }
  0x9e   : > { %v494_v1 = vor.u32 1.1754944e-38, %v493_v56  ;;  %vm492_vm4 = vcmp.eq.f32.partialorder %v491_v59, 8.507059e+37 }
  0x9f   : > { %v420_v47 = vsub.f32 0.0, %v377_v46 }
  0xa1   : > { %v1341_v48 = vpop.eup %1340  ;;  %v438_v49 = vmul.f32 1.442695, %v420_v47 }
  0xa2   : > { %v1343_v50 = vpop.eup %1342  ;;  %v467_v51 = vadd.f32 1.0, %v1341_v48 }
  0xa3   : > { %1344 = vpow2.f32 %v438_v49  ;;  %v483_v52 = vmul.f32 %v1343_v50, %v466_v44  ;;  %vm488_vm1 = vweird.f32 %v1343_v50 }
  0xa4   : > { %1346 = vrcp.f32 %v467_v51  ;;  %v379_v53 = vpop.f32.mrf.mxu0  ;;  %vm489_vm3 = vmor %vm487_vm2, %vm488_vm1  ;;  %v508_v8 = vand.u32 2147483648, %v467_v51  ;;  %v506_v11 = vand.u32 2147483647, %v467_v51  ;;  %vm502_vm6 = vweird.f32 %v467_v51 }
  0xa5   : > { %v380_v54 = vadd.f32 %v1615_v32, %v379_v53  ;;  %v484_v55 = vsub.f32 1.0, %v483_v52 }
  0xa6   : > { %v509_v17 = vor.u32 1.1754944e-38, %v508_v8  ;;  %vm507_vm8 = vcmp.eq.f32.partialorder %v506_v11, 8.507059e+37 }
  0xa7   : > { %v421_v57 = vsub.f32 0.0, %v380_v54  ;;  %v485_v58 = vmul.f32 %v1343_v50, %v484_v55 }
  0xa9   : > { %v1345_v60 = vpop.eup %1344  ;;  %v440_v61 = vmul.f32 1.442695, %v421_v57  ;;  %v486_v62 = vadd.f32 %v1343_v50, %v485_v58 }
  0xaa   : > { %v1347_v63 = vpop.eup %1346  ;;  %v468_v0 = vadd.f32 1.0, %v1345_v60 }
  0xab   : > { %1348 = vpow2.f32 %v440_v61  ;;  %v490_v2 = vsel %vm489_vm3, %v1343_v50, %v486_v62  ;;  %v498_v3 = vmul.f32 %v1347_v63, %v467_v51  ;;  %vm503_vm5 = vweird.f32 %v1347_v63 }
  0xac   : > { %1350 = vrcp.f32 %v468_v0  ;;  %v382_v4 = vpop.f32.mrf.mxu0  ;;  %v495_v5 = vsel %vm492_vm4, %v494_v1, %v490_v2  ;;  %vm504_vm7 = vmor %vm502_vm6, %vm503_vm5  ;;  %v523_v24 = vand.u32 2147483648, %v468_v0  ;;  %v521_v27 = vand.u32 2147483647, %v468_v0 }
  0xad   : > { %v383_v6 = vadd.f32 %v1615_v32, %v382_v4  ;;  %758 = vmatmul.f32.vlgmr.msra.gmra.mxu1 %v495_v5  ;;  %v499_v7 = vsub.f32 1.0, %v498_v3  ;;  %vm517_vm10 = vweird.f32 %v468_v0 }
  0xae   : > { %v524_v34 = vor.u32 1.1754944e-38, %v523_v24  ;;  %vm522_vm12 = vcmp.eq.f32.partialorder %v521_v27, 8.507059e+37 }
  0xaf   : > { %v422_v9 = vsub.f32 0.0, %v383_v6  ;;  %v500_v10 = vmul.f32 %v1347_v63, %v499_v7 }
  0xb1   : > { %v1349_v12 = vpop.eup %1348  ;;  %v442_v13 = vmul.f32 1.442695, %v422_v9  ;;  %v501_v14 = vadd.f32 %v1347_v63, %v500_v10 }
  0xb2   : > { %v1351_v15 = vpop.eup %1350  ;;  %v469_v16 = vadd.f32 1.0, %v1349_v12 }
  0xb3   : > { %1352 = vpow2.f32 %v442_v13  ;;  %v505_v18 = vsel %vm504_vm7, %v1347_v63, %v501_v14  ;;  %v513_v19 = vmul.f32 %v1351_v15, %v468_v0  ;;  %vm518_vm9 = vweird.f32 %v1351_v15 }
  0xb4   : > { %1354 = vrcp.f32 %v469_v16  ;;  %v385_v20 = vpop.f32.mrf.mxu0  ;;  %v510_v21 = vsel %vm507_vm8, %v509_v17, %v505_v18  ;;  %vm519_vm11 = vmor %vm517_vm10, %vm518_vm9  ;;  %v538_v41 = vand.u32 2147483648, %v469_v16  ;;  %v536_v44 = vand.u32 2147483647, %v469_v16 }
  0xb5   : > { %v386_v22 = vadd.f32 %v1615_v32, %v385_v20  ;;  %761 = vmatmul.f32.gmra.mxu1 %v510_v21  ;;  %v514_v23 = vsub.f32 1.0, %v513_v19  ;;  %vm532_vm14 = vweird.f32 %v469_v16 }
  0xb6   : > { %v539_v50 = vor.u32 1.1754944e-38, %v538_v41  ;;  %vm537_vm1 = vcmp.eq.f32.partialorder %v536_v44, 8.507059e+37 }
  0xb7   : > { %v423_v25 = vsub.f32 0.0, %v386_v22  ;;  %v515_v26 = vmul.f32 %v1351_v15, %v514_v23 }
  0xb9   : > { %v1353_v28 = vpop.eup %1352  ;;  %v444_v29 = vmul.f32 1.442695, %v423_v25  ;;  %v516_v30 = vadd.f32 %v1351_v15, %v515_v26 }
  0xba   : > { %v1355_v31 = vpop.eup %1354  ;;  %v470_v33 = vadd.f32 1.0, %v1353_v28 }
  0xbb   : > { %1356 = vpow2.f32 %v444_v29  ;;  %v520_v35 = vsel %vm519_vm11, %v1351_v15, %v516_v30  ;;  %v528_v36 = vmul.f32 %v1355_v31, %v469_v16  ;;  %vm533_vm13 = vweird.f32 %v1355_v31 }
  0xbc   : > { %1358 = vrcp.f32 %v470_v33  ;;  %v388_v37 = vpop.f32.mrf.mxu0  ;;  %v525_v38 = vsel %vm522_vm12, %v524_v34, %v520_v35  ;;  %vm534_vm15 = vmor %vm532_vm14, %vm533_vm13  ;;  %v553_v57 = vand.u32 2147483648, %v470_v33  ;;  %v551_v60 = vand.u32 2147483647, %v470_v33 }
  0xbd   : > { %v389_v39 = vadd.f32 %v1615_v32, %v388_v37  ;;  %764 = vmatmul.f32.gmra.mxu1 %v525_v38  ;;  %v529_v40 = vsub.f32 1.0, %v528_v36  ;;  %vm547_vm3 = vweird.f32 %v470_v33 }
  0xbe   : > { %v554_v2 = vor.u32 1.1754944e-38, %v553_v57  ;;  %vm552_vm5 = vcmp.eq.f32.partialorder %v551_v60, 8.507059e+37 }
  0xbf   : > { %v424_v42 = vsub.f32 0.0, %v389_v39  ;;  %v530_v43 = vmul.f32 %v1355_v31, %v529_v40 }
  0xc1   : > { %v1357_v45 = vpop.eup %1356  ;;  %v446_v46 = vmul.f32 1.442695, %v424_v42  ;;  %v531_v47 = vadd.f32 %v1355_v31, %v530_v43 }
  0xc2   : > { %v1359_v48 = vpop.eup %1358  ;;  %v471_v49 = vadd.f32 1.0, %v1357_v45 }
  0xc3   : > { %1360 = vpow2.f32 %v446_v46  ;;  %v535_v51 = vsel %vm534_vm15, %v1355_v31, %v531_v47  ;;  %v543_v52 = vmul.f32 %v1359_v48, %v470_v33  ;;  %vm548_vm2 = vweird.f32 %v1359_v48 }
  0xc4   : > { %1362 = vrcp.f32 %v471_v49  ;;  %v391_v53 = vpop.f32.mrf.mxu0  ;;  %v540_v54 = vsel %vm537_vm1, %v539_v50, %v535_v51  ;;  %vm549_vm4 = vmor %vm547_vm3, %vm548_vm2  ;;  %v568_v9 = vand.u32 2147483648, %v471_v49  ;;  %v566_v12 = vand.u32 2147483647, %v471_v49 }
  0xc5   : > { %v392_v55 = vadd.f32 %v1615_v32, %v391_v53  ;;  %767 = vmatmul.f32.gmra.mxu1 %v540_v54  ;;  %v544_v56 = vsub.f32 1.0, %v543_v52  ;;  %vm562_vm7 = vweird.f32 %v471_v49 }
  0xc6   : > { %v569_v18 = vor.u32 1.1754944e-38, %v568_v9  ;;  %vm567_vm9 = vcmp.eq.f32.partialorder %v566_v12, 8.507059e+37 }
  0xc7   : > { %v425_v58 = vsub.f32 0.0, %v392_v55  ;;  %v545_v59 = vmul.f32 %v1359_v48, %v544_v56 }
  0xc9   : > { %v1361_v61 = vpop.eup %1360  ;;  %v448_v62 = vmul.f32 1.442695, %v425_v58  ;;  %v546_v63 = vadd.f32 %v1359_v48, %v545_v59 }
  0xca   : > { %v1363_v0 = vpop.eup %1362  ;;  %v472_v1 = vadd.f32 1.0, %v1361_v61 }
  0xcb   : > { %1364 = vpow2.f32 %v448_v62  ;;  %v550_v3 = vsel %vm549_vm4, %v1359_v48, %v546_v63  ;;  %v558_v4 = vmul.f32 %v1363_v0, %v471_v49  ;;  %vm563_vm6 = vweird.f32 %v1363_v0 }
  0xcc   : > { %1366 = vrcp.f32 %v472_v1  ;;  %v394_v5 = vpop.f32.mrf.mxu0  ;;  %v555_v6 = vsel %vm552_vm5, %v554_v2, %v550_v3  ;;  %vm564_vm8 = vmor %vm562_vm7, %vm563_vm6  ;;  %v583_v25 = vand.u32 2147483648, %v472_v1  ;;  %v581_v28 = vand.u32 2147483647, %v472_v1 }
  0xcd   : > { %v395_v7 = vadd.f32 %v1615_v32, %v394_v5  ;;  %770 = vmatmul.f32.gmra.mxu1 %v555_v6  ;;  %v559_v8 = vsub.f32 1.0, %v558_v4  ;;  %vm577_vm11 = vweird.f32 %v472_v1 }
  0xce   : > { %v584_v35 = vor.u32 1.1754944e-38, %v583_v25  ;;  %vm582_vm13 = vcmp.eq.f32.partialorder %v581_v28, 8.507059e+37 }
  0xcf   : > { %v426_v10 = vsub.f32 0.0, %v395_v7  ;;  %v560_v11 = vmul.f32 %v1363_v0, %v559_v8 }
  0xd1   : > { %v1365_v13 = vpop.eup %1364  ;;  %v450_v14 = vmul.f32 1.442695, %v426_v10  ;;  %v561_v15 = vadd.f32 %v1363_v0, %v560_v11 }
  0xd2   : > { %v1367_v16 = vpop.eup %1366  ;;  %v473_v17 = vadd.f32 1.0, %v1365_v13 }
  0xd3   : > { %1368 = vpow2.f32 %v450_v14  ;;  %v565_v19 = vsel %vm564_vm8, %v1363_v0, %v561_v15  ;;  %v573_v20 = vmul.f32 %v1367_v16, %v472_v1  ;;  %vm578_vm10 = vweird.f32 %v1367_v16 }
  0xd4   : > { %1370 = vrcp.f32 %v473_v17  ;;  %v397_v21 = vpop.f32.mrf.mxu0  ;;  %v570_v22 = vsel %vm567_vm9, %v569_v18, %v565_v19  ;;  %vm579_vm12 = vmor %vm577_vm11, %vm578_vm10  ;;  %v598_v42 = vand.u32 2147483648, %v473_v17  ;;  %v596_v45 = vand.u32 2147483647, %v473_v17 }
  0xd5   : > { %v398_v23 = vadd.f32 %v1615_v32, %v397_v21  ;;  %773 = vmatmul.f32.gmra.mxu1 %v570_v22  ;;  %v574_v24 = vsub.f32 1.0, %v573_v20  ;;  %vm592_vm15 = vweird.f32 %v473_v17 }
  0xd6   : > { %v599_v51 = vor.u32 1.1754944e-38, %v598_v42  ;;  %vm597_vm2 = vcmp.eq.f32.partialorder %v596_v45, 8.507059e+37 }
  0xd7   : > { %v427_v26 = vsub.f32 0.0, %v398_v23  ;;  %v575_v27 = vmul.f32 %v1367_v16, %v574_v24 }
  0xd9   : > { %v1369_v29 = vpop.eup %1368  ;;  %v452_v30 = vmul.f32 1.442695, %v427_v26  ;;  %v576_v31 = vadd.f32 %v1367_v16, %v575_v27 }
  0xda   : > { %v1371_v33 = vpop.eup %1370  ;;  %v474_v34 = vadd.f32 1.0, %v1369_v29 }
  0xdb   : > { %1372 = vpow2.f32 %v452_v30  ;;  %v580_v36 = vsel %vm579_vm12, %v1367_v16, %v576_v31  ;;  %v588_v37 = vmul.f32 %v1371_v33, %v473_v17  ;;  %vm593_vm14 = vweird.f32 %v1371_v33 }
  0xdc   : > { %1374 = vrcp.f32 %v474_v34  ;;  %v400_v38 = vpop.f32.mrf.mxu0  ;;  %v585_v39 = vsel %vm582_vm13, %v584_v35, %v580_v36  ;;  %vm594_vm1 = vmor %vm592_vm15, %vm593_vm14  ;;  %v613_v58 = vand.u32 2147483648, %v474_v34  ;;  %v611_v61 = vand.u32 2147483647, %v474_v34 }
  0xdd   : > { %v401_v40 = vadd.f32 %v1615_v32, %v400_v38  ;;  %776 = vmatmul.f32.gmra.mxu1 %v585_v39  ;;  %v589_v41 = vsub.f32 1.0, %v588_v37  ;;  %vm607_vm4 = vweird.f32 %v474_v34 }
  0xde   : > { %v614_v3 = vor.u32 1.1754944e-38, %v613_v58  ;;  %vm612_vm6 = vcmp.eq.f32.partialorder %v611_v61, 8.507059e+37 }
  0xdf   : > { %v428_v43 = vsub.f32 0.0, %v401_v40  ;;  %v590_v44 = vmul.f32 %v1371_v33, %v589_v41 }
  0xe1   : > { %v1373_v46 = vpop.eup %1372  ;;  %v454_v47 = vmul.f32 1.442695, %v428_v43  ;;  %v591_v48 = vadd.f32 %v1371_v33, %v590_v44 }
  0xe2   : > { %v1375_v49 = vpop.eup %1374  ;;  %v475_v50 = vadd.f32 1.0, %v1373_v46 }
  0xe3   : > { %1376 = vpow2.f32 %v454_v47  ;;  %v595_v52 = vsel %vm594_vm1, %v1371_v33, %v591_v48  ;;  %v603_v53 = vmul.f32 %v1375_v49, %v474_v34  ;;  %vm608_vm3 = vweird.f32 %v1375_v49 }
  0xe4   : > { %1378 = vrcp.f32 %v475_v50  ;;  %v403_v54 = vpop.f32.mrf.mxu0  ;;  %v600_v55 = vsel %vm597_vm2, %v599_v51, %v595_v52  ;;  %vm609_vm5 = vmor %vm607_vm4, %vm608_vm3  ;;  %v628_v10 = vand.u32 2147483648, %v475_v50  ;;  %v626_v13 = vand.u32 2147483647, %v475_v50 }
  0xe5   : > { %v404_v56 = vadd.f32 %v1615_v32, %v403_v54  ;;  %779 = vmatmul.f32.gmra.mxu1 %v600_v55  ;;  %v604_v57 = vsub.f32 1.0, %v603_v53  ;;  %vm622_vm8 = vweird.f32 %v475_v50 }
  0xe6   : > { %v629_v19 = vor.u32 1.1754944e-38, %v628_v10  ;;  %vm627_vm10 = vcmp.eq.f32.partialorder %v626_v13, 8.507059e+37  ;;  %v1125_v10 = vld [vmem:[%s1758_s5 + $0x70] sm:$0xff]  ;;  %v1124_v13 = vld [vmem:[%s1758_s5 + $0x68] sm:$0xff] }
  0xe7   : > { %v429_v59 = vsub.f32 0.0, %v404_v56  ;;  %v605_v60 = vmul.f32 %v1375_v49, %v604_v57 }
  0xe9   : > { %v1377_v62 = vpop.eup %1376  ;;  %v456_v63 = vmul.f32 1.442695, %v429_v59  ;;  %v606_v0 = vadd.f32 %v1375_v49, %v605_v60 }
  0xea   : > { %v1379_v1 = vpop.eup %1378  ;;  %v476_v2 = vadd.f32 1.0, %v1377_v62 }
  0xeb   : > { %1380 = vpow2.f32 %v456_v63  ;;  %v610_v4 = vsel %vm609_vm5, %v1375_v49, %v606_v0  ;;  %v618_v5 = vmul.f32 %v1379_v1, %v475_v50  ;;  %vm623_vm7 = vweird.f32 %v1379_v1 }
  0xec   : > { %1382 = vrcp.f32 %v476_v2  ;;  %v406_v6 = vpop.f32.mrf.mxu0  ;;  %v615_v7 = vsel %vm612_vm6, %v614_v3, %v610_v4  ;;  %vm624_vm9 = vmor %vm622_vm8, %vm623_vm7  ;;  %v643_v26 = vand.u32 2147483648, %v476_v2  ;;  %v641_v29 = vand.u32 2147483647, %v476_v2 }
  0xed   : > { %v407_v8 = vadd.f32 %v1615_v32, %v406_v6  ;;  %782 = vmatmul.f32.gmra.mxu1 %v615_v7  ;;  %v619_v9 = vsub.f32 1.0, %v618_v5  ;;  %vm637_vm12 = vweird.f32 %v476_v2  ;;  %v1126_v7 = vld [vmem:[%s1758_s5 + $0x78] sm:$0xff] }
  0xee   : > { %v644_v36 = vor.u32 1.1754944e-38, %v643_v26  ;;  %vm642_vm14 = vcmp.eq.f32.partialorder %v641_v29, 8.507059e+37  ;;  %1131 = vmatpush.msra.mxu2 %v1126_v7  ;;  %1311 = vmatpush.msrb.mxu3 %v1126_v7  ;;  %v1121_v26 = vld [vmem:[%s1758_s5 + $0x50] sm:$0xff]  ;;  %v1120_v29 = vld [vmem:[%s1758_s5 + $0x48] sm:$0xff] }
  0xef   : > { %v430_v11 = vsub.f32 0.0, %v407_v8  ;;  %v620_v12 = vmul.f32 %v1379_v1, %v619_v9 }
  0xf0   : > { %1132 = vmatpush.msra.mxu2 %v1125_v10  ;;  %1312 = vmatpush.msrb.mxu3 %v1125_v10 }
  0xf1   : > { %v1381_v14 = vpop.eup %1380  ;;  %v458_v15 = vmul.f32 1.442695, %v430_v11  ;;  %v621_v16 = vadd.f32 %v1379_v1, %v620_v12 }
  0xf2   : > { %v1383_v17 = vpop.eup %1382  ;;  %v477_v18 = vadd.f32 1.0, %v1381_v14  ;;  %1133 = vmatpush.msra.mxu2 %v1124_v13  ;;  %1313 = vmatpush.msrb.mxu3 %v1124_v13 }
  0xf3   : > { %1384 = vpow2.f32 %v458_v15  ;;  %v625_v20 = vsel %vm624_vm9, %v1379_v1, %v621_v16  ;;  %v633_v21 = vmul.f32 %v1383_v17, %v476_v2  ;;  %vm638_vm11 = vweird.f32 %v1383_v17 }
  0xf4   : > { %1386 = vrcp.f32 %v477_v18  ;;  %v409_v22 = vpop.f32.mrf.mxu0  ;;  %v630_v23 = vsel %vm627_vm10, %v629_v19, %v625_v20  ;;  %vm639_vm13 = vmor %vm637_vm12, %vm638_vm11  ;;  %v658_v43 = vand.u32 2147483648, %v477_v18  ;;  %v656_v46 = vand.u32 2147483647, %v477_v18  ;;  %v1123_v19 = vld [vmem:[%s1758_s5 + $0x60] sm:$0xff] }
  0xf5   : > { %v410_v24 = vadd.f32 %v1615_v32, %v409_v22  ;;  %785 = vmatmul.f32.gmra.mxu1 %v630_v23  ;;  %v634_v25 = vsub.f32 1.0, %v633_v21  ;;  %vm652_vm1 = vweird.f32 %v477_v18  ;;  %1134 = vmatpush.msra.mxu2 %v1123_v19  ;;  %v1122_v23 = vld [vmem:[%s1758_s5 + $0x58] sm:$0xff] }
  0xf6   : > { %v659_v52 = vor.u32 1.1754944e-38, %v658_v43  ;;  %vm657_vm3 = vcmp.eq.f32.partialorder %v656_v46, 8.507059e+37  ;;  %1314 = vmatpush.msrb.mxu3 %v1123_v19 }
  0xf7   : > { %v431_v27 = vsub.f32 0.0, %v410_v24  ;;  %v635_v28 = vmul.f32 %v1383_v17, %v634_v25  ;;  %1135 = vmatpush.msra.mxu2 %v1122_v23 }
  0xf8   : > { %1315 = vmatpush.msrb.mxu3 %v1122_v23 }
  0xf9   : > { %v1385_v30 = vpop.eup %1384  ;;  %v460_v31 = vmul.f32 1.442695, %v431_v27  ;;  %v636_v33 = vadd.f32 %v1383_v17, %v635_v28  ;;  %1136 = vmatpush.msra.mxu2 %v1121_v26 }
  0xfa   : > { %v1387_v34 = vpop.eup %1386  ;;  %v478_v35 = vadd.f32 1.0, %v1385_v30  ;;  %1316 = vmatpush.msrb.mxu3 %v1121_v26 }
  0xfb   : > { %1388 = vpow2.f32 %v460_v31  ;;  %v640_v37 = vsel %vm639_vm13, %v1383_v17, %v636_v33  ;;  %v648_v38 = vmul.f32 %v1387_v34, %v477_v18  ;;  %vm653_vm15 = vweird.f32 %v1387_v34  ;;  %1137 = vmatpush.msra.mxu2 %v1120_v29 }
  0xfc   : > { %1390 = vrcp.f32 %v478_v35  ;;  %v412_v39 = vpop.f32.mrf.mxu0  ;;  %v645_v40 = vsel %vm642_vm14, %v644_v36, %v640_v37  ;;  %vm654_vm2 = vmor %vm652_vm1, %vm653_vm15  ;;  %v673_v59 = vand.u32 2147483648, %v478_v35  ;;  %v671_v62 = vand.u32 2147483647, %v478_v35  ;;  %1317 = vmatpush.msrb.mxu3 %v1120_v29 }
  0xfd   : > { %v413_v41 = vadd.f32 %v1615_v32, %v412_v39  ;;  %788 = vmatmul.f32.gmra.mxu1 %v645_v40  ;;  %v649_v42 = vsub.f32 1.0, %v648_v38  ;;  %vm667_vm5 = vweird.f32 %v478_v35  ;;  %v1118_v38 = vld [vmem:[%s1758_s5 + $0x38] sm:$0xff] }
  0xfe   : > { %v674_v4 = vor.u32 1.1754944e-38, %v673_v59  ;;  %vm672_vm7 = vcmp.eq.f32.partialorder %v671_v62, 8.507059e+37 }
  0xff   : > { %v432_v44 = vsub.f32 0.0, %v413_v41  ;;  %v650_v45 = vmul.f32 %v1387_v34, %v649_v42  ;;  %v1117_v41 = vld [vmem:[%s1758_s5 + $0x30] sm:$0xff] }
 0x101   : > { %v1389_v47 = vpop.eup %1388  ;;  %v462_v48 = vmul.f32 1.442695, %v432_v44  ;;  %v651_v49 = vadd.f32 %v1387_v34, %v650_v45  ;;  %v1116_v44 = vld [vmem:[%s1758_s5 + $0x28] sm:$0xff] }
 0x102   : > { %v1391_v50 = vpop.eup %1390  ;;  %v479_v51 = vadd.f32 1.0, %v1389_v47  ;;  %v1115_v47 = vld [vmem:[%s1758_s5 + $0x20] sm:$0xff] }
 0x103   : > { %1392 = vpow2.f32 %v462_v48  ;;  %v655_v53 = vsel %vm654_vm2, %v1387_v34, %v651_v49  ;;  %v663_v54 = vmul.f32 %v1391_v50, %v478_v35  ;;  %vm668_vm4 = vweird.f32 %v1391_v50  ;;  %v1119_v34 = vld [vmem:[%s1758_s5 + $0x40] sm:$0xff] }
 0x104   : > { %1394 = vrcp.f32 %v479_v51  ;;  %v415_v55 = vpop.f32.mrf.mxu0  ;;  %v660_v56 = vsel %vm657_vm3, %v659_v52, %v655_v53  ;;  %vm669_vm6 = vmor %vm667_vm5, %vm668_vm4  ;;  %v688_v9 = vand.u32 2147483648, %v479_v51  ;;  %v686_v12 = vand.u32 2147483647, %v479_v51  ;;  %1138 = vmatpush.msra.mxu2 %v1119_v34  ;;  %1318 = vmatpush.msrb.mxu3 %v1119_v34  ;;  %v1684_v52 = vld [vmem:[%s1757_s4] ss:$0 sm:$0xff]  ;;  %v1112_v53 = vld [vmem:[%s1758_s5 + $0x8] sm:$0xff] }
 0x105   : > { %v416_v57 = vadd.f32 %v1615_v32, %v415_v55  ;;  %791 = vmatmul.f32.gmra.mxu1 %v660_v56  ;;  %v664_v58 = vsub.f32 1.0, %v663_v54  ;;  %vm682_vm9 = vweird.f32 %v479_v51  ;;  %v1111_v55 = vld [vmem:[%s1758_s5] sm:$0xff] }
 0x106   : > { %v689_v18 = vor.u32 1.1754944e-38, %v688_v9  ;;  %vm687_vm11 = vcmp.eq.f32.partialorder %v686_v12, 8.507059e+37  ;;  %1139 = vmatpush.msra.mxu2 %v1118_v38  ;;  %1319 = vmatpush.msrb.mxu3 %v1118_v38 }
 0x107   : > { %v433_v60 = vsub.f32 0.0, %v416_v57  ;;  %v665_v61 = vmul.f32 %v1391_v50, %v664_v58 }
 0x108   : > { %1140 = vmatpush.msra.mxu2 %v1117_v41  ;;  %1320 = vmatpush.msrb.mxu3 %v1117_v41 }
 0x109   : > { %v1393_v63 = vpop.eup %1392  ;;  %v464_v0 = vmul.f32 1.442695, %v433_v60  ;;  %v666_v1 = vadd.f32 %v1391_v50, %v665_v61 }
 0x10a   : > { %v1395_v2 = vpop.eup %1394  ;;  %v480_v3 = vadd.f32 1.0, %v1393_v63  ;;  %1141 = vmatpush.msra.mxu2 %v1116_v44  ;;  %1321 = vmatpush.msrb.mxu3 %v1116_v44 }
 0x10b   : > { %1396 = vpow2.f32 %v464_v0  ;;  %v670_v5 = vsel %vm669_vm6, %v1391_v50, %v666_v1  ;;  %v678_v6 = vmul.f32 %v1395_v2, %v479_v51  ;;  %vm683_vm8 = vweird.f32 %v1395_v2  ;;  %v1114_v50 = vld [vmem:[%s1758_s5 + $0x18] sm:$0xff]  ;;  %v1113_v51 = vld [vmem:[%s1758_s5 + $0x10] sm:$0xff] }
 0x10c   : > { %1398 = vrcp.f32 %v480_v3  ;;  %v675_v32 = vsel %vm672_vm7, %v674_v4, %v670_v5  ;;  %vm684_vm10 = vmor %vm682_vm9, %vm683_vm8  ;;  %v703_v25 = vand.u32 2147483648, %v480_v3  ;;  %v701_v28 = vand.u32 2147483647, %v480_v3  ;;  %1142 = vmatpush.msra.mxu2 %v1115_v47  ;;  %1322 = vmatpush.msrb.mxu3 %v1115_v47 }
 0x10d   : > { %794 = vmatmul.f32.vlgmr.msra.gmra.mxu3 %v675_v32  ;;  %v679_v8 = vsub.f32 1.0, %v678_v6  ;;  %vm697_vm13 = vweird.f32 %v480_v3 }
 0x10e   : > { %v704_v33 = vor.u32 1.1754944e-38, %v703_v25  ;;  %vm702_vm15 = vcmp.eq.f32.partialorder %v701_v28, 8.507059e+37  ;;  %1143 = vmatpush.msra.mxu2 %v1114_v50  ;;  %1323 = vmatpush.msrb.mxu3 %v1114_v50 }
 0x10f   : > { %v680_v11 = vmul.f32 %v1395_v2, %v679_v8 }
 0x110   : > { %1144 = vmatpush.msra.mxu2 %v1113_v51  ;;  %1324 = vmatpush.msrb.mxu3 %v1113_v51 }
 0x111   : > { %v1397_v14 = vpop.eup %1396  ;;  %v681_v15 = vadd.f32 %v1395_v2, %v680_v11 }
 0x112   : > { %v1399_v16 = vpop.eup %1398  ;;  %v481_v17 = vadd.f32 1.0, %v1397_v14  ;;  %1145 = vmatpush.msra.mxu2 %v1112_v53  ;;  %1325 = vmatpush.msrb.mxu3 %v1112_v53 }
 0x113   : > { %v685_v20 = vsel %vm684_vm10, %v1395_v2, %v681_v15  ;;  %v693_v21 = vmul.f32 %v1399_v16, %v480_v3  ;;  %vm698_vm12 = vweird.f32 %v1399_v16 }
 0x114   : > { %1400 = vrcp.f32 %v481_v17  ;;  %v690_v22 = vsel %vm687_vm11, %v689_v18, %v685_v20  ;;  %vm699_vm14 = vmor %vm697_vm13, %vm698_vm12  ;;  %v718_v40 = vand.u32 2147483648, %v481_v17  ;;  %v716_v43 = vand.u32 2147483647, %v481_v17  ;;  %1146 = vmatpush.msra.mxu2 %v1111_v55  ;;  %1326 = vmatpush.msrb.mxu3 %v1111_v55 }
 0x115   : > { %797 = vmatmul.f32.gmra.mxu3 %v690_v22  ;;  %v694_v24 = vsub.f32 1.0, %v693_v21  ;;  %vm712_vm2 = vweird.f32 %v481_v17 }
 0x116   : > { %v719_v46 = vor.u32 1.1754944e-38, %v718_v40  ;;  %vm717_vm4 = vcmp.eq.f32.partialorder %v716_v43, 8.507059e+37 }
 0x117   : > { %v695_v27 = vmul.f32 %v1399_v16, %v694_v24 }
 0x119   : > { %v696_v30 = vadd.f32 %v1399_v16, %v695_v27 }
 0x11a   : > { %v1401_v31 = vpop.eup %1400 }
 0x11b   : > { %v700_v35 = vsel %vm699_vm14, %v1399_v16, %v696_v30  ;;  %v708_v36 = vmul.f32 %v1401_v31, %v481_v17  ;;  %vm713_vm1 = vweird.f32 %v1401_v31 }
 0x11c   : > { %v705_v37 = vsel %vm702_vm15, %v704_v33, %v700_v35  ;;  %vm714_vm3 = vmor %vm712_vm2, %vm713_vm1 }
 0x11d   : > { %800 = vmatmul.f32.gmra.mxu3 %v705_v37  ;;  %v709_v39 = vsub.f32 1.0, %v708_v36 }
 0x11f   : > { %v710_v42 = vmul.f32 %v1401_v31, %v709_v39 }
 0x121   : > { %v711_v45 = vadd.f32 %v1401_v31, %v710_v42 }
 0x123   : > { %v715_v48 = vsel %vm714_vm3, %v1401_v31, %v711_v45 }
 0x124   : > { %v720_v49 = vsel %vm717_vm4, %v719_v46, %v715_v48 }
 0x125   : > { %803 = vmatmul.f32.gmra.mxu3 %v720_v49 }
 0x12a   : > { %v759_v54 = vpop.f32.mrf.mxu1 }
 0x12b   : > { %v760_v56 = vadd.f32 %v1684_v52, %v759_v54 }
 0x12d   : > { %v807_v57 = vsub.f32 0.0, %v760_v56 }
 0x12f   : > { %v823_v58 = vmul.f32 1.442695, %v807_v57 }
 0x131   : > { %1402 = vpow2.f32 %v823_v58 }
 0x132   : > { %v762_v59 = vpop.f32.mrf.mxu1 }
 0x133   : > { %v763_v60 = vadd.f32 %v1684_v52, %v762_v59 }
 0x135   : > { %v808_v61 = vsub.f32 0.0, %v763_v60 }
 0x137   : > { %v1403_v62 = vpop.eup %1402  ;;  %v825_v63 = vmul.f32 1.442695, %v808_v61 }
 0x138   : > { %v855_v0 = vadd.f32 1.0, %v1403_v62 }
 0x139   : > { %1404 = vpow2.f32 %v825_v63 }
 0x13a   : > { %1406 = vrcp.f32 %v855_v0  ;;  %v765_v1 = vpop.f32.mrf.mxu1  ;;  %v882_v11 = vand.u32 2147483648, %v855_v0  ;;  %v880_v14 = vand.u32 2147483647, %v855_v0  ;;  %vm876_vm6 = vweird.f32 %v855_v0 }
 0x13b   : > { %v766_v2 = vadd.f32 %v1684_v52, %v765_v1 }
 0x13c   : > { %v883_v20 = vor.u32 1.1754944e-38, %v882_v11  ;;  %vm881_vm8 = vcmp.eq.f32.partialorder %v880_v14, 8.507059e+37 }
 0x13d   : > { %v809_v3 = vsub.f32 0.0, %v766_v2 }
 0x13f   : > { %v1405_v4 = vpop.eup %1404  ;;  %v827_v5 = vmul.f32 1.442695, %v809_v3 }
 0x140   : > { %v1407_v6 = vpop.eup %1406  ;;  %v856_v32 = vadd.f32 1.0, %v1405_v4 }
 0x141   : > { %1408 = vpow2.f32 %v827_v5  ;;  %v872_v7 = vmul.f32 %v1407_v6, %v855_v0  ;;  %vm877_vm5 = vweird.f32 %v1407_v6 }
 0x142   : > { %1410 = vrcp.f32 %v856_v32  ;;  %v768_v8 = vpop.f32.mrf.mxu1  ;;  %vm878_vm7 = vmor %vm876_vm6, %vm877_vm5  ;;  %v897_v27 = vand.u32 2147483648, %v856_v32  ;;  %v895_v30 = vand.u32 2147483647, %v856_v32  ;;  %vm891_vm10 = vweird.f32 %v856_v32 }
 0x143   : > { %v769_v9 = vadd.f32 %v1684_v52, %v768_v8  ;;  %v873_v10 = vsub.f32 1.0, %v872_v7 }
 0x144   : > { %v898_v37 = vor.u32 1.1754944e-38, %v897_v27  ;;  %vm896_vm12 = vcmp.eq.f32.partialorder %v895_v30, 8.507059e+37 }
 0x145   : > { %v810_v12 = vsub.f32 0.0, %v769_v9  ;;  %v874_v13 = vmul.f32 %v1407_v6, %v873_v10 }
 0x147   : > { %v1409_v15 = vpop.eup %1408  ;;  %v829_v16 = vmul.f32 1.442695, %v810_v12  ;;  %v875_v17 = vadd.f32 %v1407_v6, %v874_v13 }
 0x148   : > { %v1411_v18 = vpop.eup %1410  ;;  %v857_v19 = vadd.f32 1.0, %v1409_v15 }
 0x149   : > { %1412 = vpow2.f32 %v829_v16  ;;  %v879_v21 = vsel %vm878_vm7, %v1407_v6, %v875_v17  ;;  %v887_v22 = vmul.f32 %v1411_v18, %v856_v32  ;;  %vm892_vm9 = vweird.f32 %v1411_v18 }
 0x14a   : > { %1414 = vrcp.f32 %v857_v19  ;;  %v771_v23 = vpop.f32.mrf.mxu1  ;;  %v884_v24 = vsel %vm881_vm8, %v883_v20, %v879_v21  ;;  %vm893_vm11 = vmor %vm891_vm10, %vm892_vm9  ;;  %v912_v44 = vand.u32 2147483648, %v857_v19  ;;  %v910_v47 = vand.u32 2147483647, %v857_v19 }
 0x14b   : > { %v772_v25 = vadd.f32 %v1684_v52, %v771_v23  ;;  %1147 = vmatmul.f32.vlgmr.msra.gmra.mxu2 %v884_v24  ;;  %v888_v26 = vsub.f32 1.0, %v887_v22  ;;  %vm906_vm14 = vweird.f32 %v857_v19 }
 0x14c   : > { %v913_v54 = vor.u32 1.1754944e-38, %v912_v44  ;;  %vm911_vm1 = vcmp.eq.f32.partialorder %v910_v47, 8.507059e+37 }
 0x14d   : > { %v811_v28 = vsub.f32 0.0, %v772_v25  ;;  %v889_v29 = vmul.f32 %v1411_v18, %v888_v26 }
 0x14f   : > { %v1413_v31 = vpop.eup %1412  ;;  %v831_v33 = vmul.f32 1.442695, %v811_v28  ;;  %v890_v34 = vadd.f32 %v1411_v18, %v889_v29 }
 0x150   : > { %v1415_v35 = vpop.eup %1414  ;;  %v858_v36 = vadd.f32 1.0, %v1413_v31 }
 0x151   : > { %1416 = vpow2.f32 %v831_v33  ;;  %v894_v38 = vsel %vm893_vm11, %v1411_v18, %v890_v34  ;;  %v902_v39 = vmul.f32 %v1415_v35, %v857_v19  ;;  %vm907_vm13 = vweird.f32 %v1415_v35 }
 0x152   : > { %1418 = vrcp.f32 %v858_v36  ;;  %v774_v40 = vpop.f32.mrf.mxu1  ;;  %v899_v41 = vsel %vm896_vm12, %v898_v37, %v894_v38  ;;  %vm908_vm15 = vmor %vm906_vm14, %vm907_vm13  ;;  %v927_v61 = vand.u32 2147483648, %v858_v36  ;;  %v925_v0 = vand.u32 2147483647, %v858_v36 }
 0x153   : > { %v775_v42 = vadd.f32 %v1684_v52, %v774_v40  ;;  %1150 = vmatmul.f32.gmra.mxu2 %v899_v41  ;;  %v903_v43 = vsub.f32 1.0, %v902_v39  ;;  %vm921_vm3 = vweird.f32 %v858_v36 }
 0x154   : > { %v928_v6 = vor.u32 1.1754944e-38, %v927_v61  ;;  %vm926_vm5 = vcmp.eq.f32.partialorder %v925_v0, 8.507059e+37 }
 0x155   : > { %v812_v45 = vsub.f32 0.0, %v775_v42  ;;  %v904_v46 = vmul.f32 %v1415_v35, %v903_v43 }
 0x157   : > { %v1417_v48 = vpop.eup %1416  ;;  %v833_v49 = vmul.f32 1.442695, %v812_v45  ;;  %v905_v50 = vadd.f32 %v1415_v35, %v904_v46 }
 0x158   : > { %v1419_v51 = vpop.eup %1418  ;;  %v859_v53 = vadd.f32 1.0, %v1417_v48 }
 0x159   : > { %1420 = vpow2.f32 %v833_v49  ;;  %v909_v55 = vsel %vm908_vm15, %v1415_v35, %v905_v50  ;;  %v917_v56 = vmul.f32 %v1419_v51, %v858_v36  ;;  %vm922_vm2 = vweird.f32 %v1419_v51 }
 0x15a   : > { %1422 = vrcp.f32 %v859_v53  ;;  %v777_v57 = vpop.f32.mrf.mxu1  ;;  %v914_v58 = vsel %vm911_vm1, %v913_v54, %v909_v55  ;;  %vm923_vm4 = vmor %vm921_vm3, %vm922_vm2  ;;  %v942_v12 = vand.u32 2147483648, %v859_v53  ;;  %v940_v15 = vand.u32 2147483647, %v859_v53 }
 0x15b   : > { %v778_v59 = vadd.f32 %v1684_v52, %v777_v57  ;;  %1153 = vmatmul.f32.gmra.mxu2 %v914_v58  ;;  %v918_v60 = vsub.f32 1.0, %v917_v56  ;;  %vm936_vm7 = vweird.f32 %v859_v53 }
 0x15c   : > { %v943_v21 = vor.u32 1.1754944e-38, %v942_v12  ;;  %vm941_vm9 = vcmp.eq.f32.partialorder %v940_v15, 8.507059e+37 }
 0x15d   : > { %v813_v62 = vsub.f32 0.0, %v778_v59  ;;  %v919_v63 = vmul.f32 %v1419_v51, %v918_v60 }
 0x15f   : > { %v1421_v1 = vpop.eup %1420  ;;  %v835_v2 = vmul.f32 1.442695, %v813_v62  ;;  %v920_v3 = vadd.f32 %v1419_v51, %v919_v63 }
 0x160   : > { %v1423_v4 = vpop.eup %1422  ;;  %v860_v5 = vadd.f32 1.0, %v1421_v1 }
 0x161   : > { %1424 = vpow2.f32 %v835_v2  ;;  %v924_v32 = vsel %vm923_vm4, %v1419_v51, %v920_v3  ;;  %v932_v7 = vmul.f32 %v1423_v4, %v859_v53  ;;  %vm937_vm6 = vweird.f32 %v1423_v4 }
 0x162   : > { %1426 = vrcp.f32 %v860_v5  ;;  %v780_v8 = vpop.f32.mrf.mxu1  ;;  %v929_v9 = vsel %vm926_vm5, %v928_v6, %v924_v32  ;;  %vm938_vm8 = vmor %vm936_vm7, %vm937_vm6  ;;  %v957_v28 = vand.u32 2147483648, %v860_v5  ;;  %v955_v31 = vand.u32 2147483647, %v860_v5 }
 0x163   : > { %v781_v10 = vadd.f32 %v1684_v52, %v780_v8  ;;  %1156 = vmatmul.f32.gmra.mxu2 %v929_v9  ;;  %v933_v11 = vsub.f32 1.0, %v932_v7  ;;  %vm951_vm11 = vweird.f32 %v860_v5 }
 0x164   : > { %v958_v38 = vor.u32 1.1754944e-38, %v957_v28  ;;  %vm956_vm13 = vcmp.eq.f32.partialorder %v955_v31, 8.507059e+37 }
 0x165   : > { %v814_v13 = vsub.f32 0.0, %v781_v10  ;;  %v934_v14 = vmul.f32 %v1423_v4, %v933_v11 }
 0x167   : > { %v1425_v16 = vpop.eup %1424  ;;  %v837_v17 = vmul.f32 1.442695, %v814_v13  ;;  %v935_v18 = vadd.f32 %v1423_v4, %v934_v14 }
 0x168   : > { %v1427_v19 = vpop.eup %1426  ;;  %v861_v20 = vadd.f32 1.0, %v1425_v16 }
 0x169   : > { %1428 = vpow2.f32 %v837_v17  ;;  %v939_v22 = vsel %vm938_vm8, %v1423_v4, %v935_v18  ;;  %v947_v23 = vmul.f32 %v1427_v19, %v860_v5  ;;  %vm952_vm10 = vweird.f32 %v1427_v19 }
 0x16a   : > { %1430 = vrcp.f32 %v861_v20  ;;  %v783_v24 = vpop.f32.mrf.mxu1  ;;  %v944_v25 = vsel %vm941_vm9, %v943_v21, %v939_v22  ;;  %vm953_vm12 = vmor %vm951_vm11, %vm952_vm10  ;;  %v972_v45 = vand.u32 2147483648, %v861_v20  ;;  %v970_v48 = vand.u32 2147483647, %v861_v20 }
 0x16b   : > { %v784_v26 = vadd.f32 %v1684_v52, %v783_v24  ;;  %1159 = vmatmul.f32.gmra.mxu2 %v944_v25  ;;  %v948_v27 = vsub.f32 1.0, %v947_v23  ;;  %vm966_vm15 = vweird.f32 %v861_v20 }
 0x16c   : > { %v973_v55 = vor.u32 1.1754944e-38, %v972_v45  ;;  %vm971_vm2 = vcmp.eq.f32.partialorder %v970_v48, 8.507059e+37 }
 0x16d   : > { %v815_v29 = vsub.f32 0.0, %v784_v26  ;;  %v949_v30 = vmul.f32 %v1427_v19, %v948_v27 }
 0x16f   : > { %v1429_v33 = vpop.eup %1428  ;;  %v839_v34 = vmul.f32 1.442695, %v815_v29  ;;  %v950_v35 = vadd.f32 %v1427_v19, %v949_v30 }
 0x170   : > { %v1431_v36 = vpop.eup %1430  ;;  %v862_v37 = vadd.f32 1.0, %v1429_v33 }
 0x171   : > { %1432 = vpow2.f32 %v839_v34  ;;  %v954_v39 = vsel %vm953_vm12, %v1427_v19, %v950_v35  ;;  %v962_v40 = vmul.f32 %v1431_v36, %v861_v20  ;;  %vm967_vm14 = vweird.f32 %v1431_v36 }
 0x172   : > { %1434 = vrcp.f32 %v862_v37  ;;  %v786_v41 = vpop.f32.mrf.mxu1  ;;  %v959_v42 = vsel %vm956_vm13, %v958_v38, %v954_v39  ;;  %vm968_vm1 = vmor %vm966_vm15, %vm967_vm14  ;;  %v987_v62 = vand.u32 2147483648, %v862_v37  ;;  %v985_v1 = vand.u32 2147483647, %v862_v37 }
 0x173   : > { %v787_v43 = vadd.f32 %v1684_v52, %v786_v41  ;;  %1162 = vmatmul.f32.gmra.mxu2 %v959_v42  ;;  %v963_v44 = vsub.f32 1.0, %v962_v40  ;;  %vm981_vm4 = vweird.f32 %v862_v37 }
 0x174   : > { %v988_v32 = vor.u32 1.1754944e-38, %v987_v62  ;;  %vm986_vm6 = vcmp.eq.f32.partialorder %v985_v1, 8.507059e+37 }
 0x175   : > { %v816_v46 = vsub.f32 0.0, %v787_v43  ;;  %v964_v47 = vmul.f32 %v1431_v36, %v963_v44 }
 0x177   : > { %v1433_v49 = vpop.eup %1432  ;;  %v841_v50 = vmul.f32 1.442695, %v816_v46  ;;  %v965_v51 = vadd.f32 %v1431_v36, %v964_v47 }
 0x178   : > { %v1435_v53 = vpop.eup %1434  ;;  %v863_v54 = vadd.f32 1.0, %v1433_v49 }
 0x179   : > { %1436 = vpow2.f32 %v841_v50  ;;  %v969_v56 = vsel %vm968_vm1, %v1431_v36, %v965_v51  ;;  %v977_v57 = vmul.f32 %v1435_v53, %v862_v37  ;;  %vm982_vm3 = vweird.f32 %v1435_v53 }
 0x17a   : > { %1438 = vrcp.f32 %v863_v54  ;;  %v789_v58 = vpop.f32.mrf.mxu1  ;;  %v974_v59 = vsel %vm971_vm2, %v973_v55, %v969_v56  ;;  %vm983_vm5 = vmor %vm981_vm4, %vm982_vm3  ;;  %v1002_v13 = vand.u32 2147483648, %v863_v54  ;;  %v1000_v16 = vand.u32 2147483647, %v863_v54 }
 0x17b   : > { %v790_v60 = vadd.f32 %v1684_v52, %v789_v58  ;;  %1165 = vmatmul.f32.gmra.mxu2 %v974_v59  ;;  %v978_v61 = vsub.f32 1.0, %v977_v57  ;;  %vm996_vm8 = vweird.f32 %v863_v54 }
 0x17c   : > { %v1003_v22 = vor.u32 1.1754944e-38, %v1002_v13  ;;  %vm1001_vm10 = vcmp.eq.f32.partialorder %v1000_v16, 8.507059e+37 }
 0x17d   : > { %v817_v63 = vsub.f32 0.0, %v790_v60  ;;  %v979_v0 = vmul.f32 %v1435_v53, %v978_v61 }
 0x17f   : > { %v1437_v2 = vpop.eup %1436  ;;  %v843_v3 = vmul.f32 1.442695, %v817_v63  ;;  %v980_v4 = vadd.f32 %v1435_v53, %v979_v0 }
 0x180   : > { %v1439_v5 = vpop.eup %1438  ;;  %v864_v6 = vadd.f32 1.0, %v1437_v2 }
 0x181   : > { %1440 = vpow2.f32 %v843_v3  ;;  %v984_v7 = vsel %vm983_vm5, %v1435_v53, %v980_v4  ;;  %v992_v8 = vmul.f32 %v1439_v5, %v863_v54  ;;  %vm997_vm7 = vweird.f32 %v1439_v5 }
 0x182   : > { %1442 = vrcp.f32 %v864_v6  ;;  %v792_v9 = vpop.f32.mrf.mxu1  ;;  %v989_v10 = vsel %vm986_vm6, %v988_v32, %v984_v7  ;;  %vm998_vm9 = vmor %vm996_vm8, %vm997_vm7  ;;  %v1017_v27 = vand.u32 2147483648, %v864_v6  ;;  %v1015_v29 = vand.u32 2147483647, %v864_v6 }
 0x183   : > { %v793_v11 = vadd.f32 %v1684_v52, %v792_v9  ;;  %1168 = vmatmul.f32.gmra.mxu2 %v989_v10  ;;  %v993_v12 = vsub.f32 1.0, %v992_v8  ;;  %vm1011_vm12 = vweird.f32 %v864_v6 }
 0x184   : > { %v1018_v36 = vor.u32 1.1754944e-38, %v1017_v27  ;;  %vm1016_vm14 = vcmp.eq.f32.partialorder %v1015_v29, 8.507059e+37 }
 0x185   : > { %v818_v14 = vsub.f32 0.0, %v793_v11  ;;  %v994_v15 = vmul.f32 %v1439_v5, %v993_v12 }
 0x187   : > { %v1441_v17 = vpop.eup %1440  ;;  %v845_v18 = vmul.f32 1.442695, %v818_v14  ;;  %v995_v19 = vadd.f32 %v1439_v5, %v994_v15 }
 0x188   : > { %v1443_v20 = vpop.eup %1442  ;;  %v865_v21 = vadd.f32 1.0, %v1441_v17 }
 0x189   : > { %1444 = vpow2.f32 %v845_v18  ;;  %v999_v23 = vsel %vm998_vm9, %v1439_v5, %v995_v19  ;;  %v1007_v24 = vmul.f32 %v1443_v20, %v864_v6  ;;  %vm1012_vm11 = vweird.f32 %v1443_v20 }
 0x18a   : > { %1446 = vrcp.f32 %v865_v21  ;;  %v1004_v25 = vsel %vm1001_vm10, %v1003_v22, %v999_v23  ;;  %vm1013_vm13 = vmor %vm1011_vm12, %vm1012_vm11  ;;  %v1032_v43 = vand.u32 2147483648, %v865_v21  ;;  %v1030_v46 = vand.u32 2147483647, %v865_v21 }
 0x18b   : > { %1171 = vmatmul.f32.gmra.mxu2 %v1004_v25  ;;  %v1008_v26 = vsub.f32 1.0, %v1007_v24  ;;  %vm1026_vm1 = vweird.f32 %v865_v21 }
 0x18c   : > { %v1033_v50 = vor.u32 1.1754944e-38, %v1032_v43  ;;  %vm1031_vm3 = vcmp.eq.f32.partialorder %v1030_v46, 8.507059e+37 }
 0x18d   : > { %v1009_v28 = vmul.f32 %v1443_v20, %v1008_v26 }
 0x18f   : > { %v1445_v30 = vpop.eup %1444  ;;  %v1010_v31 = vadd.f32 %v1443_v20, %v1009_v28 }
 0x190   : > { %v1447_v33 = vpop.eup %1446  ;;  %v866_v34 = vadd.f32 1.0, %v1445_v30  ;;  %v795_v35 = vpop.f32.mrf.mxu3 }
 0x191   : > { %v796_v37 = vadd.f32 %v1684_v52, %v795_v35  ;;  %v1014_v38 = vsel %vm1013_vm13, %v1443_v20, %v1010_v31  ;;  %v1022_v39 = vmul.f32 %v1447_v33, %v865_v21  ;;  %vm1027_vm15 = vweird.f32 %v1447_v33 }
 0x192   : > { %1448 = vrcp.f32 %v866_v34  ;;  %v1019_v40 = vsel %vm1016_vm14, %v1018_v36, %v1014_v38  ;;  %vm1028_vm2 = vmor %vm1026_vm1, %vm1027_vm15  ;;  %v1047_v58 = vand.u32 2147483648, %v866_v34  ;;  %v1045_v62 = vand.u32 2147483647, %v866_v34 }
 0x193   : > { %v819_v41 = vsub.f32 0.0, %v796_v37  ;;  %1174 = vmatmul.f32.gmra.mxu2 %v1019_v40  ;;  %v1023_v42 = vsub.f32 1.0, %v1022_v39  ;;  %vm1041_vm5 = vweird.f32 %v866_v34 }
 0x194   : > { %v1048_v2 = vor.u32 1.1754944e-38, %v1047_v58  ;;  %vm1046_vm7 = vcmp.eq.f32.partialorder %v1045_v62, 8.507059e+37  ;;  %v1337_v58 = vld [vmem:[%s1759_s6] ss:$0 sm:$0xff] }
 0x195   : > { %v847_v44 = vmul.f32 1.442695, %v819_v41  ;;  %v1024_v45 = vmul.f32 %v1447_v33, %v1023_v42 }
 0x197   : > { %1450 = vpow2.f32 %v847_v44  ;;  %v1025_v47 = vadd.f32 %v1447_v33, %v1024_v45 }
 0x198   : > { %v1449_v48 = vpop.eup %1448  ;;  %v798_v49 = vpop.f32.mrf.mxu3 }
 0x199   : > { %v799_v51 = vadd.f32 %v1684_v52, %v798_v49  ;;  %v1029_v53 = vsel %vm1028_vm2, %v1447_v33, %v1025_v47  ;;  %v1037_v54 = vmul.f32 %v1449_v48, %v866_v34  ;;  %vm1042_vm4 = vweird.f32 %v1449_v48 }
 0x19a   : > { %v1034_v55 = vsel %vm1031_vm3, %v1033_v50, %v1029_v53  ;;  %vm1043_vm6 = vmor %vm1041_vm5, %vm1042_vm4 }
 0x19b   : > { %v820_v56 = vsub.f32 0.0, %v799_v51  ;;  %1177 = vmatmul.f32.gmra.mxu2 %v1034_v55  ;;  %v1038_v57 = vsub.f32 1.0, %v1037_v54 }
 0x19d   : > { %v1451_v59 = vpop.eup %1450  ;;  %v849_v60 = vmul.f32 1.442695, %v820_v56  ;;  %v1039_v61 = vmul.f32 %v1449_v48, %v1038_v57 }
 0x19e   : > { %v867_v63 = vadd.f32 1.0, %v1451_v59 }
 0x19f   : > { %1452 = vpow2.f32 %v849_v60  ;;  %v1040_v0 = vadd.f32 %v1449_v48, %v1039_v61 }
 0x1a0   : > { %1454 = vrcp.f32 %v867_v63  ;;  %v801_v1 = vpop.f32.mrf.mxu3  ;;  %v1062_v14 = vand.u32 2147483648, %v867_v63  ;;  %v1060_v17 = vand.u32 2147483647, %v867_v63  ;;  %vm1056_vm9 = vweird.f32 %v867_v63 }
 0x1a1   : > { %v802_v3 = vadd.f32 %v1684_v52, %v801_v1  ;;  %v1044_v4 = vsel %vm1043_vm6, %v1449_v48, %v1040_v0 }
 0x1a2   : > { %v1049_v5 = vsel %vm1046_vm7, %v1048_v2, %v1044_v4  ;;  %v1063_v23 = vor.u32 1.1754944e-38, %v1062_v14  ;;  %vm1061_vm11 = vcmp.eq.f32.partialorder %v1060_v17, 8.507059e+37 }
 0x1a3   : > { %v821_v6 = vsub.f32 0.0, %v802_v3  ;;  %1180 = vmatmul.f32.gmra.mxu2 %v1049_v5 }
 0x1a5   : > { %v1453_v32 = vpop.eup %1452  ;;  %v851_v7 = vmul.f32 1.442695, %v821_v6 }
 0x1a6   : > { %v1455_v8 = vpop.eup %1454  ;;  %v868_v9 = vadd.f32 1.0, %v1453_v32 }
 0x1a7   : > { %1456 = vpow2.f32 %v851_v7  ;;  %v1052_v10 = vmul.f32 %v1455_v8, %v867_v63  ;;  %vm1057_vm8 = vweird.f32 %v1455_v8 }
 0x1a8   : > { %1458 = vrcp.f32 %v868_v9  ;;  %v804_v11 = vpop.f32.mrf.mxu3  ;;  %vm1058_vm10 = vmor %vm1056_vm9, %vm1057_vm8  ;;  %v1077_v27 = vand.u32 2147483648, %v868_v9  ;;  %v1075_v29 = vand.u32 2147483647, %v868_v9  ;;  %vm1071_vm13 = vweird.f32 %v868_v9 }
 0x1a9   : > { %v805_v12 = vadd.f32 %v1684_v52, %v804_v11  ;;  %v1053_v13 = vsub.f32 1.0, %v1052_v10 }
 0x1aa   : > { %v1078_v35 = vor.u32 1.1754944e-38, %v1077_v27  ;;  %vm1076_vm15 = vcmp.eq.f32.partialorder %v1075_v29, 8.507059e+37 }
 0x1ab   : > { %v822_v15 = vsub.f32 0.0, %v805_v12  ;;  %v1054_v16 = vmul.f32 %v1455_v8, %v1053_v13 }
 0x1ad   : > { %v1457_v18 = vpop.eup %1456  ;;  %v853_v19 = vmul.f32 1.442695, %v822_v15  ;;  %v1055_v20 = vadd.f32 %v1455_v8, %v1054_v16 }
 0x1ae   : > { %v1459_v21 = vpop.eup %1458  ;;  %v869_v22 = vadd.f32 1.0, %v1457_v18 }
 0x1af   : > { %1460 = vpow2.f32 %v853_v19  ;;  %v1059_v24 = vsel %vm1058_vm10, %v1455_v8, %v1055_v20  ;;  %v1067_v25 = vmul.f32 %v1459_v21, %v868_v9  ;;  %vm1072_vm12 = vweird.f32 %v1459_v21 }
 0x1b0   : > { %1462 = vrcp.f32 %v869_v22  ;;  %v1064_v52 = vsel %vm1061_vm11, %v1063_v23, %v1059_v24  ;;  %vm1073_vm14 = vmor %vm1071_vm13, %vm1072_vm12  ;;  %v1092_v40 = vand.u32 2147483648, %v869_v22  ;;  %v1090_v42 = vand.u32 2147483647, %v869_v22 }
 0x1b1   : > { %1183 = vmatmul.f32.vlgmr.msrb.gmra.mxu3 %v1064_v52  ;;  %v1068_v26 = vsub.f32 1.0, %v1067_v25  ;;  %vm1086_vm2 = vweird.f32 %v869_v22 }
 0x1b2   : > { %v1093_v45 = vor.u32 1.1754944e-38, %v1092_v40  ;;  %vm1091_vm4 = vcmp.eq.f32.partialorder %v1090_v42, 8.507059e+37 }
 0x1b3   : > { %v1069_v28 = vmul.f32 %v1459_v21, %v1068_v26 }
 0x1b5   : > { %v1461_v30 = vpop.eup %1460  ;;  %v1070_v31 = vadd.f32 %v1459_v21, %v1069_v28 }
 0x1b6   : > { %v1463_v33 = vpop.eup %1462  ;;  %v870_v34 = vadd.f32 1.0, %v1461_v30 }
 0x1b7   : > { %v1074_v36 = vsel %vm1073_vm14, %v1459_v21, %v1070_v31  ;;  %v1082_v37 = vmul.f32 %v1463_v33, %v869_v22  ;;  %vm1087_vm1 = vweird.f32 %v1463_v33 }
 0x1b8   : > { %1464 = vrcp.f32 %v870_v34  ;;  %v1079_v38 = vsel %vm1076_vm15, %v1078_v35, %v1074_v36  ;;  %vm1088_vm3 = vmor %vm1086_vm2, %vm1087_vm1  ;;  %v1107_v50 = vand.u32 2147483648, %v870_v34  ;;  %v1105_v53 = vand.u32 2147483647, %v870_v34 }
 0x1b9   : > { %1186 = vmatmul.f32.gmra.mxu3 %v1079_v38  ;;  %v1083_v39 = vsub.f32 1.0, %v1082_v37  ;;  %vm1101_vm6 = vweird.f32 %v870_v34 }
 0x1ba   : > { %v1108_v55 = vor.u32 1.1754944e-38, %v1107_v50  ;;  %vm1106_vm8 = vcmp.eq.f32.partialorder %v1105_v53, 8.507059e+37 }
 0x1bb   : > { %v1084_v41 = vmul.f32 %v1463_v33, %v1083_v39 }
 0x1bd   : > { %v1085_v43 = vadd.f32 %v1463_v33, %v1084_v41 }
 0x1be   : > { %v1465_v44 = vpop.eup %1464 }
 0x1bf   : > { %v1089_v46 = vsel %vm1088_vm3, %v1463_v33, %v1085_v43  ;;  %v1097_v47 = vmul.f32 %v1465_v44, %v870_v34  ;;  %vm1102_vm5 = vweird.f32 %v1465_v44 }
 0x1c0   : > { %v1094_v48 = vsel %vm1091_vm4, %v1093_v45, %v1089_v46  ;;  %vm1103_vm7 = vmor %vm1101_vm6, %vm1102_vm5 }
 0x1c1   : > { %1189 = vmatmul.f32.gmra.mxu3 %v1094_v48  ;;  %v1098_v49 = vsub.f32 1.0, %v1097_v47 }
 0x1c3   : > { %v1099_v51 = vmul.f32 %v1465_v44, %v1098_v49 }
 0x1c5   : > { %v1100_v54 = vadd.f32 %v1465_v44, %v1099_v51 }
 0x1c7   : > { %v1104_v56 = vsel %vm1103_vm7, %v1465_v44, %v1100_v54 }
 0x1c8   : > { %v1109_v57 = vsel %vm1106_vm8, %v1108_v55, %v1104_v56 }
 0x1c9   : > { %1192 = vmatmul.f32.gmra.mxu3 %v1109_v57 }
 0x1ce   : > { %v1148_v59 = vpop.f32.mrf.mxu2 }
 0x1cf   : > { %v1149_v60 = vadd.f32 %v1337_v58, %v1148_v59 }
 0x1d1   : > { %1196 = vst.msk [vmem:[%s1716_s25] sm:$0xff] %vm304_vm0, %v1149_v60 }
 0x1d6   : > { %v1151_v61 = vpop.f32.mrf.mxu2 }
 0x1d7   : > { %v1152_v62 = vadd.f32 %v1337_v58, %v1151_v61 }
 0x1d9   : > { %1197 = vst.msk [vmem:[%s1716_s25 + $0x8] sm:$0xff] %vm304_vm0, %v1152_v62 }
 0x1de   : > { %v1154_v63 = vpop.f32.mrf.mxu2 }
 0x1df   : > { %v1155_v0 = vadd.f32 %v1337_v58, %v1154_v63 }
 0x1e1   : > { %1198 = vst.msk [vmem:[%s1716_s25 + $0x10] sm:$0xff] %vm304_vm0, %v1155_v0 }
 0x1e6   : > { %v1157_v1 = vpop.f32.mrf.mxu2 }
 0x1e7   : > { %v1158_v2 = vadd.f32 %v1337_v58, %v1157_v1 }
 0x1e9   : > { %1199 = vst.msk [vmem:[%s1716_s25 + $0x18] sm:$0xff] %vm304_vm0, %v1158_v2 }
 0x1ee   : > { %v1160_v3 = vpop.f32.mrf.mxu2 }
 0x1ef   : > { %v1161_v4 = vadd.f32 %v1337_v58, %v1160_v3 }
 0x1f1   : > { %1200 = vst.msk [vmem:[%s1716_s25 + $0x20] sm:$0xff] %vm304_vm0, %v1161_v4 }
 0x1f6   : > { %v1163_v5 = vpop.f32.mrf.mxu2 }
 0x1f7   : > { %v1164_v6 = vadd.f32 %v1337_v58, %v1163_v5 }
 0x1f9   : > { %1201 = vst.msk [vmem:[%s1716_s25 + $0x28] sm:$0xff] %vm304_vm0, %v1164_v6 }
 0x1fe   : > { %v1166_v32 = vpop.f32.mrf.mxu2 }
 0x1ff   : > { %v1167_v7 = vadd.f32 %v1337_v58, %v1166_v32 }
 0x201   : > { %1202 = vst.msk [vmem:[%s1716_s25 + $0x30] sm:$0xff] %vm304_vm0, %v1167_v7 }
 0x206   : > { %v1169_v8 = vpop.f32.mrf.mxu2 }
 0x207   : > { %v1170_v9 = vadd.f32 %v1337_v58, %v1169_v8 }
 0x209   : > { %1203 = vst.msk [vmem:[%s1716_s25 + $0x38] sm:$0xff] %vm304_vm0, %v1170_v9 }
 0x20e   : > { %v1172_v10 = vpop.f32.mrf.mxu2 }
 0x20f   : > { %v1173_v11 = vadd.f32 %v1337_v58, %v1172_v10 }
 0x211   : > { %1204 = vst.msk [vmem:[%s1716_s25 + $0x40] sm:$0xff] %vm304_vm0, %v1173_v11 }
 0x216   : > { %v1175_v12 = vpop.f32.mrf.mxu2 }
 0x217   : > { %v1176_v13 = vadd.f32 %v1337_v58, %v1175_v12 }
 0x219   : > { %1205 = vst.msk [vmem:[%s1716_s25 + $0x48] sm:$0xff] %vm304_vm0, %v1176_v13 }
 0x21e   : > { %v1178_v14 = vpop.f32.mrf.mxu2 }
 0x21f   : > { %v1179_v15 = vadd.f32 %v1337_v58, %v1178_v14 }
 0x221   : > { %1206 = vst.msk [vmem:[%s1716_s25 + $0x50] sm:$0xff] %vm304_vm0, %v1179_v15 }
 0x226   : > { %v1181_v16 = vpop.f32.mrf.mxu2 }
 0x227   : > { %v1182_v17 = vadd.f32 %v1337_v58, %v1181_v16 }
 0x229   : > { %1207 = vst.msk [vmem:[%s1716_s25 + $0x58] sm:$0xff] %vm304_vm0, %v1182_v17 }
 0x234   : > { %v1184_v18 = vpop.f32.mrf.mxu3 }
 0x235   : > { %v1185_v19 = vadd.f32 %v1337_v58, %v1184_v18 }
 0x237   : > { %1208 = vst.msk [vmem:[%s1716_s25 + $0x60] sm:$0xff] %vm304_vm0, %v1185_v19 }
 0x23c   : > { %v1187_v20 = vpop.f32.mrf.mxu3 }
 0x23d   : > { %v1188_v21 = vadd.f32 %v1337_v58, %v1187_v20 }
 0x23f   : > { %1209 = vst.msk [vmem:[%s1716_s25 + $0x68] sm:$0xff] %vm304_vm0, %v1188_v21 }
 0x244   : > { %v1190_v22 = vpop.f32.mrf.mxu3 }
 0x245   : > { %v1191_v23 = vadd.f32 %v1337_v58, %v1190_v22 }
 0x247   : > { %1210 = vst.msk [vmem:[%s1716_s25 + $0x70] sm:$0xff] %vm304_vm0, %v1191_v23 }
 0x24c   : > { %v1193_v24 = vpop.f32.mrf.mxu3 }
 0x24d   : > { %v1194_v25 = vadd.f32 %v1337_v58, %v1193_v24 }
 0x24f   : > { %1211 = vst.msk [vmem:[%s1716_s25 + $0x78] sm:$0xff] %vm304_vm0, %v1194_v25 }
 0x250 PF: > { %s17_s24 = sadd.s32 1, %s1472_s24  }
 0x251   : > { %p14_p4 = scmp.ge.s32.totalorder %s17_s24, 6  }
 0x253   :  { %16 = sbr.rel (!%p14_p4) target bundleno = 1 (0x1), region = 78 }

</bundles_post_ra>
